<compile_context>
chip_gen: v6e
topology: v6e:2x2x1
jax: 0.10.0
libtpu: 0.0.40
codegen_flags: <defaults>
</compile_context>

<pallas_src>
import functools

import jax
import jax.numpy as jnp
import numpy as np
from jax.experimental import pallas as pl
from jax.experimental.pallas import tpu as pltpu


# ---------------------------------------------------------------------------
# Shared in-kernel helpers.
# Packed state layout: [B, 4H] = [h1 | c1 | h2 | c2]; gate order (PyTorch): i,f,g,o
# ---------------------------------------------------------------------------
def _gate_mask(B, H):
    lane = jax.lax.broadcasted_iota(jnp.int32, (B, 4 * H), 1)
    return (lane >= 2 * H) & (lane < 3 * H)          # True on the g-gate lanes


def _activate(gates, g_mask):
    # Single EUP pass over the [B, 4H] slab: sigmoid(x) == 0.5*(tanh(x/2) + 1).
    pre = jnp.where(g_mask, gates, 0.5 * gates)
    t = jnp.tanh(pre)
    return jnp.where(g_mask, t, 0.5 * t + 0.5)


def _cell_update(act, c, H):
    i = act[:, 0 * H:1 * H]
    f = act[:, 1 * H:2 * H]
    g = act[:, 2 * H:3 * H]
    o = act[:, 3 * H:4 * H]
    c_new = f * c + i * g
    h_new = o * jnp.tanh(c_new)
    return h_new, c_new


def _dot(a, w):
    # Cast LHS to the (possibly bf16) weight dtype, accumulate in f32 on the MXU.
    return jnp.dot(a.astype(w.dtype), w, preferred_element_type=jnp.float32)


# ---------------------------------------------------------------------------
# Generic projection kernel:  Y[R, N] = X[R, K] @ W[K, N] + b[1, N]
# Used for the hoisted layer-1 input projection and the deferred output
# projection (both lane-dense, N multiple of 128).  Full-block at these sizes;
# tile over rows for very long sequences.
# ---------------------------------------------------------------------------
def _matmul_bias_kernel(x_ref, w_ref, b_ref, o_ref):
    w = w_ref[...]
    o_ref[...] = _dot(x_ref[...], w) + b_ref[...]


def _project(x2d, w, b):
    rows = x2d.shape[0]
    n = w.shape[1]

    def full(a):
        return pl.BlockSpec(a.shape, lambda: (0,) * a.ndim)

    return pl.pallas_call(
        _matmul_bias_kernel,
        out_shape=jax.ShapeDtypeStruct((rows, n), jnp.float32),
        in_specs=[full(x2d), full(w), full(b)],
        out_specs=pl.BlockSpec((rows, n), lambda: (0, 0)),
    )(x2d, w, b)


# ---------------------------------------------------------------------------
# Single-step kernel (exact module forward semantics).
# ---------------------------------------------------------------------------
def _lstm2_step_kernel(x_ref, s_ref, wih1_ref, whh1_ref, b1_ref,
                       wih2_ref, whh2_ref, b2_ref, wlin_ref, blin_ref,
                       s_out_ref, out_ref):
    B, H4 = s_ref.shape
    H = H4 // 4
    state = s_ref[...]
    h1 = state[:, 0 * H:1 * H]
    c1 = state[:, 1 * H:2 * H]
    h2 = state[:, 2 * H:3 * H]
    c2 = state[:, 3 * H:4 * H]
    g_mask = _gate_mask(B, H)

    # Layer 1: two separate dots (no concat scratch).
    gates1 = _dot(x_ref[...], wih1_ref[...]) + _dot(h1, whh1_ref[...]) + b1_ref[...]
    h1n, c1n = _cell_update(_activate(gates1, g_mask), c1, H)

    # Layer 2.
    gates2 = _dot(h1n, wih2_ref[...]) + _dot(h2, whh2_ref[...]) + b2_ref[...]
    h2n, c2n = _cell_update(_activate(gates2, g_mask), c2, H)

    # Final linear (output padded to a 128-lane-dense slab via padded weights).
    out_ref[...] = _dot(h2n, wlin_ref[...]) + blin_ref[...]

    # Packed new state (aliased in place with the packed state input).
    s_out_ref[:, 0 * H:1 * H] = h1n
    s_out_ref[:, 1 * H:2 * H] = c1n
    s_out_ref[:, 2 * H:3 * H] = h2n
    s_out_ref[:, 3 * H:4 * H] = c2n


def _lstm_step_packed(x, state, params):
    B, H4 = state.shape
    out_pad = params["blin_pad"].shape[1]
    inputs = (x, state,
              params["wih1"], params["whh1"], params["b1"],
              params["wih2"], params["whh2"], params["b2"],
              params["wlin_pad"], params["blin_pad"])

    def full(a):
        return pl.BlockSpec(a.shape, lambda: (0,) * a.ndim)

    new_state, out_padded = pl.pallas_call(
        _lstm2_step_kernel,
        out_shape=(jax.ShapeDtypeStruct((B, H4), jnp.float32),
                   jax.ShapeDtypeStruct((B, out_pad), jnp.float32)),
        in_specs=[full(a) for a in inputs],
        out_specs=(pl.BlockSpec((B, H4), lambda: (0, 0)),
                   pl.BlockSpec((B, out_pad), lambda: (0, 0))),
        input_output_aliases={1: 0},        # packed state updated in place
    )(*inputs)
    return out_padded, new_state


@functools.partial(jax.jit, static_argnames=("out_size",))
def lstm_forward_packed(x, state, params, *, out_size):
    """Single step with caller-visible packed [B, 4H] state (no repack HLOs)."""
    out_padded, new_state = _lstm_step_packed(x, state, params)
    return out_padded[:, :out_size], new_state


@functools.partial(jax.jit, static_argnames=("out_size",))
def lstm_forward(x, hiddens, params, *, out_size):
    """Pallas equivalent of LSTM.forward(x, hiddens) (single step, module API)."""
    (h1, c1), (h2, c2) = hiddens
    H = h1.shape[1]
    state = jnp.concatenate([h1, c1, h2, c2], axis=-1)     # [B, 4H]
    out_padded, ns = _lstm_step_packed(x, state, params)
    out = out_padded[:, :out_size]
    return out, [[ns[:, 0:H], ns[:, H:2 * H]],
                 [ns[:, 2 * H:3 * H], ns[:, 3 * H:4 * H]]]


# ---------------------------------------------------------------------------
# Sequence recurrence kernel: grid over time blocks of TU unrolled steps.
# Layer-1 input projection is precomputed (gx streamed); h2[t] is emitted per
# step for the deferred output projection; the carry lives in the
# constant-index-map output block (VMEM-resident, one HBM writeback).
# ---------------------------------------------------------------------------
def _lstm2_recurrence_kernel(gx_ref, s0_ref, whh1_ref, wih2_ref, whh2_ref, b2_ref,
                             h2_seq_ref, carry_ref):
    B, H4 = s0_ref.shape
    H = H4 // 4
    TU = gx_ref.shape[0]
    tb = pl.program_id(0)

    @pl.when(tb == 0)
    def _():
        carry_ref[...] = s0_ref[...]

    # Hoisted loop invariants: weights, bias broadcast, gate-lane mask.
    whh1 = whh1_ref[...]
    wih2 = wih2_ref[...]
    whh2 = whh2_ref[...]
    b2 = jnp.broadcast_to(b2_ref[...], (B, 4 * H))
    g_mask = _gate_mask(B, H)

    state = carry_ref[...]
    carry0 = (state[:, 0 * H:1 * H], state[:, 1 * H:2 * H],
              state[:, 2 * H:3 * H], state[:, 3 * H:4 * H])

    def step(u, carry):
        h1, c1, h2, c2 = carry
        # Layer 1: input projection + bias precomputed -> one recurrent dot.
        gates1 = gx_ref[u] + _dot(h1, whh1)
        h1n, c1n = _cell_update(_activate(gates1, g_mask), c1, H)
        # Layer 2: two recurrent dots.
        gates2 = _dot(h1n, wih2) + _dot(h2, whh2) + b2
        h2n, c2n = _cell_update(_activate(gates2, g_mask), c2, H)

        h2_seq_ref[u, :, :] = h2n           # collected for deferred out-proj
        return (h1n, c1n, h2n, c2n)

    h1, c1, h2, c2 = jax.lax.fori_loop(0, TU, step, carry0, unroll=True)

    # Carry to the next time block; constant out index map => stays VMEM
    # resident across the grid, written back to HBM once at the end.
    carry_ref[:, 0 * H:1 * H] = h1
    carry_ref[:, 1 * H:2 * H] = c1
    carry_ref[:, 2 * H:3 * H] = h2
    carry_ref[:, 3 * H:4 * H] = c2


def _pick_unroll(T, preferred):
    tu = max(1, min(preferred, T))
    while T % tu != 0:
        tu -= 1
    return tu


@functools.partial(jax.jit,
                   static_argnames=("out_size", "time_unroll", "vmem_limit_bytes"))
def lstm_sequence_forward(x_seq, hiddens, params, *, out_size,
                          time_unroll=4, vmem_limit_bytes=None):
    """Run the 2-layer LSTM over a whole sequence.

    Three passes: (A) hoisted layer-1 input projection over all timesteps,
    (B) the serial recurrence with TU timesteps unrolled per grid step,
    (C) deferred output projection over all timesteps.
    """
    (h1, c1), (h2, c2) = hiddens
    B, H = h1.shape
    T, _, IN = x_seq.shape
    out_pad = params["blin_pad"].shape[1]
    TU = _pick_unroll(T, time_unroll)

    state0 = jnp.concatenate([h1, c1, h2, c2], axis=-1)      # [B, 4H]

    # --- Phase A: non-recurrent input projection, one big MXU pass -----------
    gx = _project(x_seq.reshape(T * B, IN), params["wih1"], params["b1"])
    gx = gx.reshape(T, B, 4 * H)

    # --- Phase B: serial recurrence ------------------------------------------
    def resident(a):
        return pl.BlockSpec(a.shape, lambda tb: (0,) * a.ndim)

    grid_spec = pltpu.PrefetchScalarGridSpec(
        num_scalar_prefetch=0,
        grid=(T // TU,),
        in_specs=[
            pl.BlockSpec((TU, B, 4 * H), lambda tb: (tb, 0, 0)),   # gx streamed
            resident(state0),
            resident(params["whh1"]),
            resident(params["wih2"]),
            resident(params["whh2"]),
            resident(params["b2"]),
        ],
        out_specs=[
            pl.BlockSpec((TU, B, H), lambda tb: (tb, 0, 0)),       # h2[t] streamed
            pl.BlockSpec((B, 4 * H), lambda tb: (0, 0)),           # carry/final state
        ],
    )

    h2_seq, s_fin = pl.pallas_call(
        _lstm2_recurrence_kernel,
        out_shape=(jax.ShapeDtypeStruct((T, B, H), jnp.float32),
                   jax.ShapeDtypeStruct((B, 4 * H), jnp.float32)),
        grid_spec=grid_spec,
        compiler_params=pltpu.CompilerParams(
            dimension_semantics=("arbitrary",),      # sequential recurrence
            vmem_limit_bytes=vmem_limit_bytes),
    )(gx, state0, params["whh1"], params["wih2"], params["whh2"], params["b2"])

    # --- Phase C: deferred output projection, one big MXU pass ---------------
    out_padded = _project(h2_seq.reshape(T * B, H),
                          params["wlin_pad"], params["blin_pad"])
    outs = out_padded.reshape(T, B, out_pad)[:, :, :out_size]

    return outs, [[s_fin[:, 0:H], s_fin[:, H:2 * H]],
                  [s_fin[:, 2 * H:3 * H], s_fin[:, 3 * H:4 * H]]]


# ---------------------------------------------------------------------------
# Parameter init (PyTorch-style) + kernel-friendly transposed/padded layout.
# weight_dtype=jnp.bfloat16 is the v6e/v7x setting (f32 accumulation kept).
# ---------------------------------------------------------------------------
def init_params(key, in_size, hidden_size, out_size, weight_dtype=jnp.float32):
    ks = jax.random.split(key, 10)
    bound = 1.0 / np.sqrt(hidden_size)

    def u(k, shape):
        return jax.random.uniform(k, shape, jnp.float32, -bound, bound)

    # Raw PyTorch-shaped params (used by the independent reference).
    w_ih1 = u(ks[0], (4 * hidden_size, in_size))
    w_hh1 = u(ks[1], (4 * hidden_size, hidden_size))
    b_ih1 = u(ks[2], (4 * hidden_size,))
    b_hh1 = u(ks[3], (4 * hidden_size,))

    w_ih2 = u(ks[4], (4 * hidden_size, hidden_size))
    w_hh2 = u(ks[5], (4 * hidden_size, hidden_size))
    b_ih2 = u(ks[6], (4 * hidden_size,))
    b_hh2 = u(ks[7], (4 * hidden_size,))

    w_lin = u(ks[8], (out_size, hidden_size))
    b_lin = u(ks[9], (out_size,))

    out_pad = max(128, ((out_size + 127) // 128) * 128)

    kernel_params = {
        "wih1": w_ih1.T.astype(weight_dtype),                  # [IN, 4H]
        "whh1": w_hh1.T.astype(weight_dtype),                  # [H, 4H]
        "b1": (b_ih1 + b_hh1)[None, :].astype(jnp.float32),    # [1, 4H]
        "wih2": w_ih2.T.astype(weight_dtype),                  # [H, 4H]
        "whh2": w_hh2.T.astype(weight_dtype),                  # [H, 4H]
        "b2": (b_ih2 + b_hh2)[None, :].astype(jnp.float32),    # [1, 4H]
        # Linear weights zero-padded to a 128-lane-dense output slab.
        "wlin_pad": jnp.pad(w_lin.T, ((0, 0), (0, out_pad - out_size))
                            ).astype(weight_dtype),            # [H, out_pad]
        "blin_pad": jnp.pad(b_lin[None, :], ((0, 0), (0, out_pad - out_size))
                            ).astype(jnp.float32),             # [1, out_pad]
    }
    raw_params = dict(w_ih1=w_ih1, w_hh1=w_hh1, b_ih1=b_ih1, b_hh1=b_hh1,
                      w_ih2=w_ih2, w_hh2=w_hh2, b_ih2=b_ih2, b_hh2=b_hh2,
                      w_lin=w_lin, b_lin=b_lin)
    return kernel_params, raw_params


# ---------------------------------------------------------------------------
# Pure-JAX reference built from RAW PyTorch-layout weights, mirroring
# nn.LSTMCell + nn.Linear (independent of the kernel's fused/padded layout).
# ---------------------------------------------------------------------------
def _reference_forward(x, hiddens, raw):
    def cell(x_in, h, c, w_ih, w_hh, b_ih, b_hh):
        gates = x_in @ w_ih.T + h @ w_hh.T + b_ih + b_hh
        H = h.shape[1]
        i = jax.nn.sigmoid(gates[:, 0 * H:1 * H])
        f = jax.nn.sigmoid(gates[:, 1 * H:2 * H])
        g = jnp.tanh(gates[:, 2 * H:3 * H])
        o = jax.nn.sigmoid(gates[:, 3 * H:4 * H])
        c_new = f * c + i * g
        return o * jnp.tanh(c_new), c_new

    (h1, c1), (h2, c2) = hiddens
    h1n, c1n = cell(x, h1, c1, raw["w_ih1"], raw["w_hh1"], raw["b_ih1"], raw["b_hh1"])
    h2n, c2n = cell(h1n, h2, c2, raw["w_ih2"], raw["w_hh2"], raw["b_ih2"], raw["b_hh2"])
    out = h2n @ raw["w_lin"].T + raw["b_lin"]
    return out, [[h1n, c1n], [h2n, c2n]]


if __name__ == "__main__":
    BATCH, IN_SIZE, HIDDEN, OUT_SIZE, SEQ_LEN = 2, 16, 32, 8, 8

    key = jax.random.PRNGKey(0)
    k_x, k_h1, k_c1, k_h2, k_c2, k_p, k_xs = jax.random.split(key, 7)

    x = jax.random.normal(k_x, (BATCH, IN_SIZE), jnp.float32)
    hiddens = [
        [jax.random.normal(k_h1, (BATCH, HIDDEN), jnp.float32),
         jax.random.normal(k_c1, (BATCH, HIDDEN), jnp.float32)],
        [jax.random.normal(k_h2, (BATCH, HIDDEN), jnp.float32),
         jax.random.normal(k_c2, (BATCH, HIDDEN), jnp.float32)],
    ]
    params, raw = init_params(k_p, IN_SIZE, HIDDEN, OUT_SIZE)

    # --- single step (exact module forward semantics) -----------------------
    out, new_hiddens = lstm_forward(x, hiddens, params, out_size=OUT_SIZE)
    jax.block_until_ready(out)
    jax.block_until_ready(new_hiddens)

    ref_out, ref_hid = _reference_forward(x, hiddens, raw)
    assert np.allclose(np.asarray(out), np.asarray(ref_out), atol=1e-4), "step output mismatch"
    for (a_h, a_c), (r_h, r_c) in zip(new_hiddens, ref_hid):
        assert np.allclose(np.asarray(a_h), np.asarray(r_h), atol=1e-4)
        assert np.allclose(np.asarray(a_c), np.asarray(r_c), atol=1e-4)

    # --- single step, packed-state API ---------------------------------------
    state0 = jnp.concatenate([hiddens[0][0], hiddens[0][1],
                              hiddens[1][0], hiddens[1][1]], axis=-1)
    out_p, state_p = lstm_forward_packed(x, state0, params, out_size=OUT_SIZE)
    jax.block_until_ready(out_p)
    assert np.allclose(np.asarray(out_p), np.asarray(ref_out), atol=1e-4)
    ref_state = jnp.concatenate([ref_hid[0][0], ref_hid[0][1],
                                 ref_hid[1][0], ref_hid[1][1]], axis=-1)
    assert np.allclose(np.asarray(state_p), np.asarray(ref_state), atol=1e-4)

    # --- fused sequence path (hoisted projections + TU-unrolled recurrence) --
    x_seq = jax.random.normal(k_xs, (SEQ_LEN, BATCH, IN_SIZE), jnp.float32)
    outs, final_hiddens = lstm_sequence_forward(x_seq, hiddens, params,
                                                out_size=OUT_SIZE, time_unroll=4)
    jax.block_until_ready(outs)
    jax.block_until_ready(final_hiddens)

    ref_hid_t = hiddens
    ref_outs = []
    for t in range(SEQ_LEN):
        o_t, ref_hid_t = _reference_forward(x_seq[t], ref_hid_t, raw)
        ref_outs.append(o_t)
    ref_outs = jnp.stack(ref_outs)
    assert np.allclose(np.asarray(outs), np.asarray(ref_outs), atol=1e-4), "sequence output mismatch"
    for (a_h, a_c), (r_h, r_c) in zip(final_hiddens, ref_hid_t):
        assert np.allclose(np.asarray(a_h), np.asarray(r_h), atol=1e-4)
        assert np.allclose(np.asarray(a_c), np.asarray(r_c), atol=1e-4)

    # --- bf16-weight variant (v6e/v7x MXU-native), f32 accumulation ----------
    params_bf16, _ = init_params(k_p, IN_SIZE, HIDDEN, OUT_SIZE,
                                 weight_dtype=jnp.bfloat16)
    outs_bf, final_bf = lstm_sequence_forward(x_seq, hiddens, params_bf16,
                                              out_size=OUT_SIZE, time_unroll=4)
    jax.block_until_ready(outs_bf)
    assert np.allclose(np.asarray(outs_bf), np.asarray(ref_outs), atol=1.5e-1), \
        "bf16 sequence output mismatch"
    for (a_h, a_c), (r_h, r_c) in zip(final_bf, ref_hid_t):
        assert np.allclose(np.asarray(a_h), np.asarray(r_h), atol=1.5e-1)
        assert np.allclose(np.asarray(a_c), np.asarray(r_c), atol=1.5e-1)

    print("KERNEL_OK")
</pallas_src>

<mosaic_0001>
module attributes {stable_mosaic.version = 11 : i64} {
  func.func @_lstm2_step_kernel(%arg0: memref<2x16xf32, #tpu.memory_space<vmem>>, %arg1: memref<2x128xf32, #tpu.memory_space<vmem>>, %arg2: memref<16x128xf32, #tpu.memory_space<vmem>>, %arg3: memref<32x128xf32, #tpu.memory_space<vmem>>, %arg4: memref<1x128xf32, #tpu.memory_space<vmem>>, %arg5: memref<32x128xf32, #tpu.memory_space<vmem>>, %arg6: memref<32x128xf32, #tpu.memory_space<vmem>>, %arg7: memref<1x128xf32, #tpu.memory_space<vmem>>, %arg8: memref<32x128xf32, #tpu.memory_space<vmem>>, %arg9: memref<1x128xf32, #tpu.memory_space<vmem>>, %arg10: memref<2x128xf32, #tpu.memory_space<vmem>>, %arg11: memref<2x128xf32, #tpu.memory_space<vmem>>) attributes {dimension_semantics = [], scalar_prefetch = 0 : i64, scratch_operands = 0 : i64, tpu.core_type = #tpu.core_type<tc>} {
    %c0 = arith.constant 0 : index
    %c0_0 = arith.constant 0 : index
    %0 = vector.load %arg1[%c0, %c0_0] : memref<2x128xf32, #tpu.memory_space<vmem>>, vector<2x128xf32>
    %1 = vector.extract_strided_slice %0 {offsets = [0, 0], sizes = [2, 32], strides = [1, 1]} : vector<2x128xf32> to vector<2x32xf32>
    %2 = vector.extract_strided_slice %0 {offsets = [0, 32], sizes = [2, 32], strides = [1, 1]} : vector<2x128xf32> to vector<2x32xf32>
    %3 = vector.extract_strided_slice %0 {offsets = [0, 64], sizes = [2, 32], strides = [1, 1]} : vector<2x128xf32> to vector<2x32xf32>
    %4 = vector.extract_strided_slice %0 {offsets = [0, 96], sizes = [2, 32], strides = [1, 1]} : vector<2x128xf32> to vector<2x32xf32>
    %5 = tpu.iota {dimensions = array<i32: 1>} : vector<2x128xi32>
    %c64_i32 = arith.constant 64 : i32
    %6 = vector.broadcast %c64_i32 : i32 to vector<2x128xi32>
    %7 = arith.cmpi sge, %5, %6 : vector<2x128xi32>
    %c96_i32 = arith.constant 96 : i32
    %8 = vector.broadcast %c96_i32 : i32 to vector<2x128xi32>
    %9 = arith.cmpi slt, %5, %8 : vector<2x128xi32>
    %10 = arith.andi %7, %9 : vector<2x128xi1>
    %c0_1 = arith.constant 0 : index
    %c0_2 = arith.constant 0 : index
    %11 = vector.load %arg0[%c0_1, %c0_2] : memref<2x16xf32, #tpu.memory_space<vmem>>, vector<2x16xf32>
    %c0_3 = arith.constant 0 : index
    %c0_4 = arith.constant 0 : index
    %12 = vector.load %arg2[%c0_3, %c0_4] : memref<16x128xf32, #tpu.memory_space<vmem>>, vector<16x128xf32>
    %cst = arith.constant dense<0.000000e+00> : vector<2x128xf32>
    %13 = tpu.matmul %11, %12, %cst {dimension_numbers = #tpu.dot_dimension_numbers<[1], [0], [0], [1], [0, 0, 1, 1], [], []>} : vector<2x16xf32>, vector<16x128xf32>, vector<2x128xf32> -> vector<2x128xf32>
    %c0_5 = arith.constant 0 : index
    %c0_6 = arith.constant 0 : index
    %14 = vector.load %arg3[%c0_5, %c0_6] : memref<32x128xf32, #tpu.memory_space<vmem>>, vector<32x128xf32>
    %cst_7 = arith.constant dense<0.000000e+00> : vector<2x128xf32>
    %15 = tpu.matmul %1, %14, %cst_7 {dimension_numbers = #tpu.dot_dimension_numbers<[1], [0], [0], [1], [0, 0, 1, 1], [], []>} : vector<2x32xf32>, vector<32x128xf32>, vector<2x128xf32> -> vector<2x128xf32>
    %16 = arith.addf %13, %15 : vector<2x128xf32>
    %c0_8 = arith.constant 0 : index
    %c0_9 = arith.constant 0 : index
    %17 = vector.load %arg4[%c0_8, %c0_9] : memref<1x128xf32, #tpu.memory_space<vmem>>, vector<1x128xf32>
    %18 = vector.broadcast %17 : vector<1x128xf32> to vector<2x128xf32>
    %19 = arith.addf %16, %18 : vector<2x128xf32>
    %cst_10 = arith.constant 5.000000e-01 : f32
    %20 = vector.broadcast %cst_10 : f32 to vector<2x128xf32>
    %21 = arith.mulf %20, %19 : vector<2x128xf32>
    %22 = arith.select %10, %19, %21 : vector<2x128xi1>, vector<2x128xf32>
    %23 = math.tanh %22 : vector<2x128xf32>
    %cst_11 = arith.constant 5.000000e-01 : f32
    %24 = vector.broadcast %cst_11 : f32 to vector<2x128xf32>
    %25 = arith.mulf %24, %23 : vector<2x128xf32>
    %cst_12 = arith.constant 5.000000e-01 : f32
    %26 = vector.broadcast %cst_12 : f32 to vector<2x128xf32>
    %27 = arith.addf %25, %26 : vector<2x128xf32>
    %28 = arith.select %10, %23, %27 : vector<2x128xi1>, vector<2x128xf32>
    %29 = vector.extract_strided_slice %28 {offsets = [0, 0], sizes = [2, 32], strides = [1, 1]} : vector<2x128xf32> to vector<2x32xf32>
    %30 = vector.extract_strided_slice %28 {offsets = [0, 32], sizes = [2, 32], strides = [1, 1]} : vector<2x128xf32> to vector<2x32xf32>
    %31 = vector.extract_strided_slice %28 {offsets = [0, 64], sizes = [2, 32], strides = [1, 1]} : vector<2x128xf32> to vector<2x32xf32>
    %32 = vector.extract_strided_slice %28 {offsets = [0, 96], sizes = [2, 32], strides = [1, 1]} : vector<2x128xf32> to vector<2x32xf32>
    %33 = arith.mulf %30, %2 : vector<2x32xf32>
    %34 = arith.mulf %29, %31 : vector<2x32xf32>
    %35 = arith.addf %33, %34 : vector<2x32xf32>
    %36 = math.tanh %35 : vector<2x32xf32>
    %37 = arith.mulf %32, %36 : vector<2x32xf32>
    %c0_13 = arith.constant 0 : index
    %c0_14 = arith.constant 0 : index
    %38 = vector.load %arg5[%c0_13, %c0_14] : memref<32x128xf32, #tpu.memory_space<vmem>>, vector<32x128xf32>
    %cst_15 = arith.constant dense<0.000000e+00> : vector<2x128xf32>
    %39 = tpu.matmul %37, %38, %cst_15 {dimension_numbers = #tpu.dot_dimension_numbers<[1], [0], [0], [1], [0, 0, 1, 1], [], []>} : vector<2x32xf32>, vector<32x128xf32>, vector<2x128xf32> -> vector<2x128xf32>
    %c0_16 = arith.constant 0 : index
    %c0_17 = arith.constant 0 : index
    %40 = vector.load %arg6[%c0_16, %c0_17] : memref<32x128xf32, #tpu.memory_space<vmem>>, vector<32x128xf32>
    %cst_18 = arith.constant dense<0.000000e+00> : vector<2x128xf32>
    %41 = tpu.matmul %3, %40, %cst_18 {dimension_numbers = #tpu.dot_dimension_numbers<[1], [0], [0], [1], [0, 0, 1, 1], [], []>} : vector<2x32xf32>, vector<32x128xf32>, vector<2x128xf32> -> vector<2x128xf32>
    %42 = arith.addf %39, %41 : vector<2x128xf32>
    %c0_19 = arith.constant 0 : index
    %c0_20 = arith.constant 0 : index
    %43 = vector.load %arg7[%c0_19, %c0_20] : memref<1x128xf32, #tpu.memory_space<vmem>>, vector<1x128xf32>
    %44 = vector.broadcast %43 : vector<1x128xf32> to vector<2x128xf32>
    %45 = arith.addf %42, %44 : vector<2x128xf32>
    %cst_21 = arith.constant 5.000000e-01 : f32
    %46 = vector.broadcast %cst_21 : f32 to vector<2x128xf32>
    %47 = arith.mulf %46, %45 : vector<2x128xf32>
    %48 = arith.select %10, %45, %47 : vector<2x128xi1>, vector<2x128xf32>
    %49 = math.tanh %48 : vector<2x128xf32>
    %cst_22 = arith.constant 5.000000e-01 : f32
    %50 = vector.broadcast %cst_22 : f32 to vector<2x128xf32>
    %51 = arith.mulf %50, %49 : vector<2x128xf32>
    %cst_23 = arith.constant 5.000000e-01 : f32
    %52 = vector.broadcast %cst_23 : f32 to vector<2x128xf32>
    %53 = arith.addf %51, %52 : vector<2x128xf32>
    %54 = arith.select %10, %49, %53 : vector<2x128xi1>, vector<2x128xf32>
    %55 = vector.extract_strided_slice %54 {offsets = [0, 0], sizes = [2, 32], strides = [1, 1]} : vector<2x128xf32> to vector<2x32xf32>
    %56 = vector.extract_strided_slice %54 {offsets = [0, 32], sizes = [2, 32], strides = [1, 1]} : vector<2x128xf32> to vector<2x32xf32>
    %57 = vector.extract_strided_slice %54 {offsets = [0, 64], sizes = [2, 32], strides = [1, 1]} : vector<2x128xf32> to vector<2x32xf32>
    %58 = vector.extract_strided_slice %54 {offsets = [0, 96], sizes = [2, 32], strides = [1, 1]} : vector<2x128xf32> to vector<2x32xf32>
    %59 = arith.mulf %56, %4 : vector<2x32xf32>
    %60 = arith.mulf %55, %57 : vector<2x32xf32>
    %61 = arith.addf %59, %60 : vector<2x32xf32>
    %62 = math.tanh %61 : vector<2x32xf32>
    %63 = arith.mulf %58, %62 : vector<2x32xf32>
    %c0_24 = arith.constant 0 : index
    %c0_25 = arith.constant 0 : index
    %64 = vector.load %arg8[%c0_24, %c0_25] : memref<32x128xf32, #tpu.memory_space<vmem>>, vector<32x128xf32>
    %cst_26 = arith.constant dense<0.000000e+00> : vector<2x128xf32>
    %65 = tpu.matmul %63, %64, %cst_26 {dimension_numbers = #tpu.dot_dimension_numbers<[1], [0], [0], [1], [0, 0, 1, 1], [], []>} : vector<2x32xf32>, vector<32x128xf32>, vector<2x128xf32> -> vector<2x128xf32>
    %c0_27 = arith.constant 0 : index
    %c0_28 = arith.constant 0 : index
    %66 = vector.load %arg9[%c0_27, %c0_28] : memref<1x128xf32, #tpu.memory_space<vmem>>, vector<1x128xf32>
    %67 = vector.broadcast %66 : vector<1x128xf32> to vector<2x128xf32>
    %68 = arith.addf %65, %67 : vector<2x128xf32>
    %c0_29 = arith.constant 0 : index
    %c0_30 = arith.constant 0 : index
    %69 = vector.load %arg11[%c0_29, %c0_30] : memref<2x128xf32, #tpu.memory_space<vmem>>, vector<2x128xf32>
    tpu.vector_store %arg11[%c0_29, %c0_30], %68 {strides = array<i32>} : memref<2x128xf32, #tpu.memory_space<vmem>>, vector<2x128xf32>,
    %c0_31 = arith.constant 0 : index
    %c0_32 = arith.constant 0 : index
    %70 = vector.load %arg10[%c0_31, %c0_32] : memref<2x128xf32, #tpu.memory_space<vmem>>, vector<2x32xf32>
    tpu.vector_store %arg10[%c0_31, %c0_32], %37 {strides = array<i32>} : memref<2x128xf32, #tpu.memory_space<vmem>>, vector<2x32xf32>,
    %c0_33 = arith.constant 0 : index
    %c32 = arith.constant 32 : index
    %71 = vector.load %arg10[%c0_33, %c32] : memref<2x128xf32, #tpu.memory_space<vmem>>, vector<2x32xf32>
    tpu.vector_store %arg10[%c0_33, %c32], %35 {strides = array<i32>} : memref<2x128xf32, #tpu.memory_space<vmem>>, vector<2x32xf32>,
    %c0_34 = arith.constant 0 : index
    %c64 = arith.constant 64 : index
    %72 = vector.load %arg10[%c0_34, %c64] : memref<2x128xf32, #tpu.memory_space<vmem>>, vector<2x32xf32>
    tpu.vector_store %arg10[%c0_34, %c64], %63 {strides = array<i32>} : memref<2x128xf32, #tpu.memory_space<vmem>>, vector<2x32xf32>,
    %c0_35 = arith.constant 0 : index
    %c96 = arith.constant 96 : index
    %73 = vector.load %arg10[%c0_35, %c96] : memref<2x128xf32, #tpu.memory_space<vmem>>, vector<2x32xf32>
    tpu.vector_store %arg10[%c0_35, %c96], %61 {strides = array<i32>} : memref<2x128xf32, #tpu.memory_space<vmem>>, vector<2x32xf32>,
    return
  }
}

</mosaic_0001>

<bundles_post_ra>
// kernel: lstm_forward.1
= control target key start
LH: loop header
LB: loop body
LE: loop exit
PB: predicated region body
PF: predicated region fallthrough
CT: control target
= control target key end

     0   :  { %17 = vsyncpa [#allocation3], 0  ;;  %s994_s0 = inlined_call_operand.vmem [shape: f32[2,16], index: 0, kind: input, shape index: {}]   ;;  %s995_s1 = inlined_call_operand.vmem [shape: f32[2,128], index: 1, kind: input, shape index: {}, may-alias: {1,10}]   ;;  %s996_s2 = inlined_call_operand.vmem [shape: f32[16,128], index: 2, kind: input, shape index: {}]   ;;  %s997_s3 = inlined_call_operand.hbm [shape: f32[32,128], index: 3, kind: input, shape index: {}]   ;;  %s998_s4 = inlined_call_operand.vmem [shape: f32[1,128], index: 4, kind: input, shape index: {}]   ;;  %s999_s5 = inlined_call_operand.hbm [shape: f32[32,128], index: 5, kind: input, shape index: {}]   ;;  %s1000_s6 = inlined_call_operand.hbm [shape: f32[32,128], index: 6, kind: input, shape index: {}]   ;;  %s1001_s7 = inlined_call_operand.vmem [shape: f32[1,128], index: 7, kind: input, shape index: {}]   ;;  %s1002_s8 = inlined_call_operand.hbm [shape: f32[32,128], index: 8, kind: input, shape index: {}]   ;;  %s1003_s9 = inlined_call_operand.vmem [shape: f32[1,128], index: 9, kind: input, shape index: {}]   ;;  %s1004_s10 = inlined_call_operand.vmem [shape: f32[2,128], index: 10, kind: output, shape index: {0}, may-alias: {1,10}]   ;;  %s1005_s11 = inlined_call_operand.hbm [shape: f32[2,128], index: 11, kind: output, shape index: {1}]  }
   0x1   :  { %18 = vsyncpa [#allocation6], 0 }
   0x2   :  { %19 = vsyncpa [#allocation9], 0 }
   0x3   :  { %20 = vsyncpa [#allocation4], 0  ;;  %s808_s17 = smov [#allocation5]   ;;  %s809_s19 = smov [#allocation2]  }
   0x4   :  { %s46_s18 = sshll.u32 %s808_s17, 4  ;;  %s32_s20 = sshll.u32 %s809_s19, 4  ;;  %s47_s18 = int_to_ptr.vmem [resolvable:$true] %s46_s18  ;;  %s33_s20 = int_to_ptr.vmem [resolvable:$true] %s32_s20 }
   0x5   :  { %s708_s21 = scalar_lea.vmem %s47_s18, 512  ;;  %p713_p1 = scmp.lt.s32.totalorder %s47_s18, %s47_s18 }
   0x6   :  { %p709_p0 = scmp.ne.s32.totalorder %s47_s18, %s708_s21  ;;  %p714_p2 = scmp.lt.s32.totalorder %s708_s21, %s708_s21 }
   0x8   :  { %p715_p3 = por %p714_p2, %p713_p1 }
   0xa   :  { %p716_p4 = pnand %p715_p3, %p709_p0 }
   0xc   :  { %719 = shalt.err (!%p716_p4)
}
   0xd   :  { %s810_s22 = smov 128   ;;  %s811_s23 = smov 8  }
   0xe   :  { %52 = dma.hbm_to_vmem [thread:$0]  %s999_s5, 512, %s47_s18, [#allocation6], %s810_s22, %s810_s22, %s811_s23  }
   0xf   :  { %s728_s26 = scalar_lea.vmem %s33_s20, 512  ;;  %p733_p6 = scmp.lt.s32.totalorder %s33_s20, %s33_s20 }
  0x10   :  { %p729_p5 = scmp.ne.s32.totalorder %s33_s20, %s728_s26  ;;  %p734_p7 = scmp.lt.s32.totalorder %s728_s26, %s728_s26 }
  0x12   :  { %p735_p8 = por %p734_p7, %p733_p6 }
  0x14   :  { %p736_p9 = pnand %p735_p8, %p729_p5 }
  0x16   :  { %739 = shalt.err (!%p736_p9)
}
  0x17   :  { %38 = dma.hbm_to_vmem [thread:$0]  %s997_s3, 512, %s33_s20, [#allocation3], %s810_s22, %s810_s22, %s811_s23  }
  0x18   :  { %s812_s29 = smov [#allocation7]   ;;  %s813_s12 = smov [#allocation8]  }
  0x19   :  { %s58_s30 = sshll.u32 %s812_s29, 4  ;;  %s72_s13 = sshll.u32 %s813_s12, 4  ;;  %s59_s30 = int_to_ptr.vmem [resolvable:$true] %s58_s30  ;;  %s73_s13 = int_to_ptr.vmem [resolvable:$true] %s72_s13 }
  0x1a   :  { %s748_s5 = scalar_lea.vmem %s59_s30, 512  ;;  %p753_p11 = scmp.lt.s32.totalorder %s59_s30, %s59_s30 }
  0x1b   :  { %p749_p10 = scmp.ne.s32.totalorder %s59_s30, %s748_s5  ;;  %p754_p12 = scmp.lt.s32.totalorder %s748_s5, %s748_s5 }
  0x1d   :  { %p755_p13 = por %p754_p12, %p753_p11 }
  0x1f   :  { %p756_p0 = pnand %p755_p13, %p749_p10 }
  0x21   :  { %759 = shalt.err (!%p756_p0)
}
  0x22   :  { %64 = dma.hbm_to_vmem [thread:$0]  %s1000_s6, 512, %s59_s30, [#allocation6], %s810_s22, %s810_s22, %s811_s23  }
  0x23   :  { %s768_s3 = scalar_lea.vmem %s73_s13, 512  ;;  %p773_p2 = scmp.lt.s32.totalorder %s73_s13, %s73_s13 }
  0x24   :  { %p769_p1 = scmp.ne.s32.totalorder %s73_s13, %s768_s3  ;;  %p774_p3 = scmp.lt.s32.totalorder %s768_s3, %s768_s3 }
  0x26   :  { %p775_p4 = por %p774_p3, %p773_p2 }
  0x28   :  { %p776_p5 = pnand %p775_p4, %p769_p1 }
  0x2a   :  { %779 = shalt.err (!%p776_p5)
}
  0x2b   :  { %78 = dma.hbm_to_vmem [thread:$0]  %s1002_s8, 512, %s73_s13, [#allocation9], %s810_s22, %s810_s22, %s811_s23  }
  0x2c   :  { %800 = dma.done.wait [#allocation3], 512  }
  0x2d   :  { %801 = vsyncadd [#allocation3], 4294966784 }
  0x2e   :  { %802 = dma.done.wait [#allocation6], 1024  }
  0x2f   :  { %803 = vsyncadd [#allocation6], 4294966272 }
  0x30   :  { %804 = dma.done.wait [#allocation9], 512  }
  0x31   :  { %805 = vsyncadd [#allocation9], 4294966784  ;;  %v814_v0 = vmov 0.0   ;;  %vm815_vm0 = vmmov 0   ;;  %v105_v1 = vld [vmem:[#allocation2 + $0x18] sm:$0xff]  ;;  %v104_v2 = vld [vmem:[#allocation2 + $0x10] sm:$0xff]  ;;  %v94_v9 = vlaneseq }
  0x32   :  { %629 = vmatprep.subr.mxu0 %v814_v0  ;;  %640 = vmatprep.subr.mxu1 %v814_v0  ;;  %v101_v3 = vld [vmem:[%s996_s2 + $0x8] sm:$0xff]  ;;  %v100_v4 = vld [vmem:[%s996_s2] sm:$0xff]  ;;  %vm180_vm1 = vcmask 130048   ;;  %vm106_vm2 = vcmask 261120   ;;  %s816_s2 = smov 64   ;;  %v292_v30 = vld [vmem:[#allocation7 + $0x18] sm:$0xff] }
  0x33   :  { %644 = vmatprep.mubr.msk.f32.mxu1 %vm815_vm0, %v814_v0  ;;  %637 = vmatprep.mubr.msk.f32.mxu0 %vm815_vm0, %v814_v0  ;;  %v99_v5 = vld [vmem:[%s994_s0] sm:$0x3]  ;;  %v103_v6 = vld [vmem:[#allocation2 + $0x8] sm:$0xff]  ;;  %v95_v11 = vand.u32 127, %v94_v9  ;;  %v291_v31 = vld [vmem:[#allocation7 + $0x10] sm:$0xff]  ;;  %vm562_vm6 = vcmask 254976  }
  0x34   :  { %630 = vmatpush3.msra.mxu0 %v105_v1  ;;  %641 = vmatpush3.msra.mxu1 %v101_v3  ;;  %v102_v7 = vld [vmem:[#allocation2] sm:$0xff]  ;;  %v288_v32 = vld [vmem:[#allocation5 + $0x18] sm:$0xff]  ;;  %v287_v33 = vld [vmem:[#allocation5 + $0x10] sm:$0xff]  ;;  %vm564_vm7 = vcmask 517376   ;;  %vm569_vm8 = vcmask 779776   ;;  %vm575_vm9 = vcmask 1042176  }
  0x35   :  { %631 = vmatprep.subr.mxu0 %v814_v0  ;;  %642 = vmatprep.subr.mxu1 %v814_v0  ;;  %v93_v8 = vld [vmem:[%s995_s1] sm:$0x3]  ;;  %vm96_vm3 = vcmp.ge.s32.totalorder %v95_v11, 64  ;;  %vm97_vm4 = vcmp.lt.s32.totalorder %v95_v11, 96  ;;  %v290_v34 = vld [vmem:[#allocation7 + $0x8] sm:$0xff]  ;;  %v477_v61 = vld [vmem:[#allocation8 + $0x18] sm:$0xff] }
  0x36   :  { %632 = vmatpush3.msra.mxu0 %v104_v2  ;;  %643 = vmatpush3.msra.mxu1 %v100_v4  ;;  %v600_v14 = vld [vmem:[%s998_s4] ss:$0 sm:$0xff]  ;;  %vm936_vm5 = vmand %vm96_vm3, %vm97_vm4  ;;  %s817_s4 = smov 32   ;;  %v286_v35 = vld [vmem:[#allocation5 + $0x8] sm:$0xff]  ;;  %s819_s3 = smov [#allocation10]  }
  0x37   :  { %633 = vmatprep.subr.mxu0 %v814_v0  ;;  %645 = vmatmul.mubr.msk.f32.vlgmr.msra.gmra.mxu1 %vm180_vm1, %v99_v5  ;;  %v289_v36 = vld [vmem:[#allocation7] sm:$0xff]  ;;  %v476_v62 = vld [vmem:[#allocation8 + $0x10] sm:$0xff]  ;;  %v475_v63 = vld [vmem:[#allocation8 + $0x8] sm:$0xff]  ;;  %s585_s16 = sshll.u32 %s819_s3, 4  ;;  %s586_s16 = int_to_ptr.vmem [resolvable:$true] %s585_s16 }
  0x38   :  { %634 = vmatpush3.msra.mxu0 %v103_v6  ;;  %647 = vmatprep.subr.mxu1 %v814_v0  ;;  %v285_v37 = vld [vmem:[#allocation5] sm:$0xff]  ;;  %s780_s17 = scalar_lea.vmem %s586_s16, 32  ;;  %p785_p7 = scmp.lt.s32.totalorder %s586_s16, %s586_s16 }
  0x39   :  { %635 = vmatprep.subr.mxu0 %v814_v0  ;;  %655 = vmatprep.mubr.msk.f32.mxu1 %vm815_vm0, %v814_v0  ;;  %v603_v46 = vld [vmem:[%s1001_s7] ss:$0 sm:$0xff]  ;;  %s818_s7 = smov 96   ;;  %p781_p6 = scmp.ne.s32.totalorder %s586_s16, %s780_s17 }
  0x3a   :  { %636 = vmatpush3.msra.mxu0 %v102_v7  ;;  %648 = vmatpush3.msra.mxu1 %v292_v30  ;;  %v474_v1 = vld [vmem:[#allocation8] sm:$0xff]  ;;  %p786_p8 = scmp.lt.s32.totalorder %s780_s17, %s780_s17 }
  0x3b   :  { %638 = vmatmul.mubr.msk.f32.vlgmr.msra.gmra.mxu0 %vm106_vm2, %v93_v8  ;;  %658 = vmatprep.subr.mxu0 %v814_v0  ;;  %v604_v7 = vld [vmem:[%s1003_s9] ss:$0 sm:$0xff] }
  0x3c   :  { %666 = vmatprep.mubr.msk.f32.mxu0 %vm815_vm0, %v814_v0  ;;  %659 = vmatpush3.msra.mxu0 %v288_v32  ;;  %p787_p9 = por %p786_p8, %p785_p7 }
  0x3d   :  { %649 = vmatprep.subr.mxu1 %v814_v0  ;;  %660 = vmatprep.subr.mxu0 %v814_v0 }
  0x3e   :  { %650 = vmatpush3.msra.mxu1 %v291_v31  ;;  %661 = vmatpush3.msra.mxu0 %v287_v33  ;;  %p788_p10 = pnand %p787_p9, %p781_p6 }
  0x3f   :  { %651 = vmatprep.subr.mxu1 %v814_v0  ;;  %662 = vmatprep.subr.mxu0 %v814_v0 }
  0x40   :  { %652 = vmatpush3.msra.mxu1 %v290_v34  ;;  %663 = vmatpush3.msra.mxu0 %v286_v35 }
  0x41   :  { %653 = vmatprep.subr.mxu1 %v814_v0  ;;  %664 = vmatprep.subr.mxu0 %v814_v0 }
  0x42   :  { %654 = vmatpush3.msra.mxu1 %v289_v36  ;;  %665 = vmatpush3.msra.mxu0 %v285_v37 }
  0x43   :  { %669 = vmatprep.subr.mxu1 %v814_v0 }
  0xf7   :  { %v250_v10 = vpop.f32.mrf.mxu1 }
  0xf9   :  { %v646_v12 = vpop.f32.mrf.mxu1 }
  0xfb   :  { %v176_v13 = vpop.f32.mrf.mxu0 }
  0xfc   :  { %v251_v15 = vadd.f32 %v250_v10, %v176_v13 }
  0xfd   :  { %v639_v16 = vpop.f32.mrf.mxu0 }
  0xfe   :  { %v261_v17 = vadd.f32 %v600_v14, %v251_v15 }
 0x100   :  { %v262_v19 = vmul.f32 0.5, %v261_v17 }
 0x102   :  { %v263_v20 = vsel %vm936_vm5, %v261_v17, %v262_v19 }
 0x103   :  { %692 = vtanh.f32 %v263_v20 }
 0x110   :  { %v693_v21 = vpop.eup %692 }
 0x111   :  { %v265_v22 = vmul.f32 0.5, %v693_v21 }
 0x113   :  { %v266_v23 = vadd.f32 0.5, %v265_v22 }
 0x115   :  { %v267_v24 = vsel %vm936_vm5, %v693_v21, %v266_v23 }
 0x116   :  { %270 = vrot.lane.b32.xlu0 %v267_v24, %s816_s2  ;;  %v268_v27 = vmul.f32 %v267_v24, %v93_v8 }
 0x188   :  { %v271_v25 = vpop.permute.xlu0 %270 }
 0x189   :  { %v273_v26 = vmul.f32 %v271_v25, %v267_v24 }
 0x18b   :  { %275 = vrot.lane.b32.xlu0 %v273_v26, %s817_s4 }
 0x1fd   :  { %v276_v28 = vpop.permute.xlu0 %275 }
 0x1fe   :  { %v278_v29 = vadd.f32 %v276_v28, %v268_v27 }
 0x200   :  { %694 = vtanh.f32 %v278_v29 }
 0x20d   :  { %v695_v38 = vpop.eup %694 }
 0x20e   :  { %281 = vrot.lane.b32.xlu1 %v695_v38, %s816_s2 }
 0x212   :  { %293 = vrot.lane.b32.xlu1 %v93_v8, %s816_s2 }
 0x280   :  { %v282_v39 = vpop.permute.xlu1 %281 }
 0x281   :  { %v284_v40 = vmul.f32 %v282_v39, %v267_v24 }
 0x283   :  { %368 = vrot.lane.b32.xlu0 %v284_v40, %s817_s4 }
 0x284   :  { %v294_v41 = vpop.permute.xlu1 %293 }
 0x285   :  { %656 = vmatmul.mubr.msk.f32.vlgmr.msra.gmra.mxu1 %vm106_vm2, %v294_v41 }
 0x286   :  { %677 = vmatprep.mubr.msk.f32.mxu1 %vm815_vm0, %v814_v0  ;;  %670 = vmatpush3.msra.mxu1 %v477_v61 }
 0x287   :  { %671 = vmatprep.subr.mxu1 %v814_v0 }
 0x288   :  { %672 = vmatpush3.msra.mxu1 %v476_v62 }
 0x289   :  { %673 = vmatprep.subr.mxu1 %v814_v0 }
 0x28a   :  { %674 = vmatpush3.msra.mxu1 %v475_v63 }
 0x28b   :  { %675 = vmatprep.subr.mxu1 %v814_v0 }
 0x28c   :  { %676 = vmatpush3.msra.mxu1 %v474_v1 }
 0x2f5   :  { %v369_v42 = vpop.permute.xlu0 %368 }
 0x2f6   :  { %563 = vst.msk [vmem:[%s1004_s10] sm:$0x3] %vm562_vm6, %v369_v42  ;;  %667 = vmatmul.mubr.msk.f32.vlgmr.msra.gmra.mxu0 %vm106_vm2, %v369_v42 }
 0x2f7   :  { %565 = vst.msk [vmem:[%s1004_s10] sm:$0x3] %vm564_vm7, %v278_v29 }
 0x345   :  { %v363_v43 = vpop.f32.mrf.mxu1 }
 0x347   :  { %v657_v44 = vpop.f32.mrf.mxu1 }
 0x3b6   :  { %v438_v45 = vpop.f32.mrf.mxu0 }
 0x3b7   :  { %v439_v47 = vadd.f32 %v438_v45, %v363_v43 }
 0x3b8   :  { %v668_v48 = vpop.f32.mrf.mxu0 }
 0x3b9   :  { %v449_v49 = vadd.f32 %v603_v46, %v439_v47 }
 0x3bb   :  { %v450_v50 = vmul.f32 0.5, %v449_v49 }
 0x3bd   :  { %v451_v51 = vsel %vm936_vm5, %v449_v49, %v450_v50 }
 0x3be   :  { %696 = vtanh.f32 %v451_v51 }
 0x3cb   :  { %v697_v52 = vpop.eup %696 }
 0x3cc   :  { %v453_v53 = vmul.f32 0.5, %v697_v52 }
 0x3ce   :  { %v454_v54 = vadd.f32 0.5, %v453_v53 }
 0x3d0   :  { %v455_v55 = vsel %vm936_vm5, %v697_v52, %v454_v54 }
 0x3d1   :  { %459 = vrot.lane.b32.xlu1 %v455_v55, %s816_s2  ;;  %v457_v58 = vmul.f32 %v455_v55, %v294_v41 }
 0x443   :  { %v460_v56 = vpop.permute.xlu1 %459 }
 0x444   :  { %v462_v57 = vmul.f32 %v460_v56, %v455_v55 }
 0x446   :  { %464 = vrot.lane.b32.xlu0 %v462_v57, %s817_s4 }
 0x4b8   :  { %v465_v59 = vpop.permute.xlu0 %464 }
 0x4b9   :  { %v467_v60 = vadd.f32 %v465_v59, %v457_v58 }
 0x4bb   :  { %698 = vtanh.f32 %v467_v60 }
 0x4c8   :  { %v699_v2 = vpop.eup %698 }
 0x4c9   :  { %470 = vrot.lane.b32.xlu1 %v699_v2, %s816_s2 }
 0x53b   :  { %v471_v3 = vpop.permute.xlu1 %470 }
 0x53c   :  { %v473_v4 = vmul.f32 %v471_v3, %v455_v55 }
 0x53e   :  { %566 = vrot.lane.b32.xlu1 %v473_v4, %s818_s7  ;;  %486 = vrot.lane.b32.xlu0 %v473_v4, %s817_s4 }
 0x542   :  { %572 = vrot.lane.b32.xlu0 %v467_v60, %s816_s2 }
 0x5b0   :  { %v567_v5 = vpop.permute.xlu1 %566  ;;  %v487_v6 = vpop.permute.xlu0 %486 }
 0x5b1   :  { %570 = vst.msk [vmem:[%s1004_s10] sm:$0x3] %vm569_vm8, %v567_v5  ;;  %678 = vmatmul.mubr.msk.f32.vlgmr.msra.gmra.mxu1 %vm106_vm2, %v487_v6 }
 0x5b4   :  { %v573_v0 = vpop.permute.xlu0 %572 }
 0x5b5   :  { %576 = vst.msk [vmem:[%s1004_s10] sm:$0x3] %vm575_vm9, %v573_v0 }
 0x671   :  { %v556_v8 = vpop.f32.mrf.mxu1 }
 0x672   :  { %v557_v9 = vadd.f32 %v604_v7, %v556_v8 }
 0x673   :  { %v679_v10 = vpop.f32.mrf.mxu1 }
 0x674   :  { %560 = vst [vmem:[#allocation10] sm:$0x3] %v557_v9 }
 0x675   :  { %791 = shalt.err (!%p788_p10)
}
 0x676   :  { %588 = dma.vmem_to_hbm [thread:$0]  %s586_s16, 32, %s1005_s11, [#allocation4]  }
 0x677   :  { %806 = dma.done.wait [#allocation4], 32  }
 0x678   :  { %807 = vsyncadd [#allocation4], 4294967264 }
 0x679   :  { %594 = vsyncpa [#allocation3], 1 }
 0x67a   :  { %595 = vsyncpa [#allocation6], 1 }
 0x67b   :  { %596 = vsyncpa [#allocation9], 1 }
 0x67c   :  { %597 = vsyncpa [#allocation4], 1 }

</bundles_post_ra>
